<compile_context>
chip_gen: v7x
topology: tpu7x:2x2x1
jax: 0.10.0
libtpu: 0.0.40
codegen_flags: <defaults>
</compile_context>

<pallas_src>
import functools

import jax
import jax.numpy as jnp
from jax.experimental import pallas as pl
from jax.experimental.pallas import tpu as pltpu


_VMEM_LIMIT_BYTES = 48 * 1024 * 1024      # safe on v5e/v6e (128 MiB) and v7x (64 MiB / TC)
_VMEM_WORKSET_BUDGET = 40 * 1024 * 1024   # conservative ceiling for the fused working set

_TAPS = tuple((dy, dx) for dy in (-1, 0, 1) for dx in (-1, 0, 1))   # (dy_off, dx_off), row-major


def _fused_bottleneck_kernel(x_ref, w1_ref, s1_ref, w2_ref, s2_ref,
                             w3_ref, s3_ref, mask_ref, o_ref, *, w_img):
    """Whole Bottleneck on one lane-dense (C, H*W) slab resident in VMEM."""
    x = x_ref[0]                                             # (C_in, HW), f32
    hw = x.shape[-1]

    # --- conv1 (1x1) + bn1 + ReLU ----------------------------------------
    y1 = jnp.dot(w1_ref[...], x, preferred_element_type=jnp.float32)
    y1 = jnp.maximum(y1 + s1_ref[...], 0.0)                  # (width, HW)

    # --- conv2 (3x3, pad=1) + bn2 + ReLU ----------------------------------
    # In-VMEM 9-tap im2col: tap(dy,dx)[p] = y1[p + dy*W + dx] masked at image borders.
    # Rolls go to the XLU, masks to the VPU, and the 9 matmuls keep the MXU fed; nothing
    # of the 9x expansion touches HBM.
    acc = jnp.zeros(y1.shape, jnp.float32)
    for t, (dy, dx) in enumerate(_TAPS):
        shift = dy * w_img + dx                              # source offset: p -> p + shift
        if dy == 0 and dx == 0:
            tap = y1                                         # center tap: no roll, mask == 1
        else:
            tap = pltpu.roll(y1, shift=(-shift) % hw, axis=1) * mask_ref[t]
        acc = acc + jnp.dot(w2_ref[t], tap, preferred_element_type=jnp.float32)
    y2 = jnp.maximum(acc + s2_ref[...], 0.0)                 # (width, HW)

    # --- conv3 (1x1) + bn3 + residual add + ReLU --------------------------
    y3 = jnp.dot(w3_ref[...], y2, preferred_element_type=jnp.float32)
    out = jnp.maximum(y3 + s3_ref[...] + x, 0.0)
    o_ref[0] = out.astype(o_ref.dtype)


def _fold_bn(w2d, gamma, beta, mean, var, eps):
    """Eval-mode BN folded into a 2-D conv weight and a per-channel shift column."""
    scale = gamma / jnp.sqrt(var + eps)
    return w2d * scale[:, None], (beta - mean * scale)[:, None]


def _conv2_tap_masks(h, w, dtype):
    """(9, 1, H*W) validity masks for the 9 taps of a padding=1 3x3 conv."""
    p = jnp.arange(h * w, dtype=jnp.int32)
    row, col = p // w, p % w
    masks = []
    for dy, dx in _TAPS:
        ok = (row + dy >= 0) & (row + dy < h) & (col + dx >= 0) & (col + dx < w)
        masks.append(ok.astype(dtype))
    return jnp.stack(masks).reshape(9, 1, h * w)


def _vmem_workset_bytes(c_in, width, c_out, hw, itemsize):
    # Pallas double-buffers every BlockSpec operand (constant-index weights included),
    # so count 2x for all inputs/outputs; intermediates (y1/tap/acc/y2/y3) are f32 values.
    io_elems = 2 * (c_in * hw + c_out * hw                          # x tile, out tile
                    + width * c_in + 9 * width * width + c_out * width   # folded weights
                    + 2 * width + c_out                              # shifts
                    + 9 * hw)                                        # tap masks
    interm_elems = (4 * width + 2 * c_out) * hw
    return io_elems * itemsize + interm_elems * 4


@jax.jit
def bottleneck_forward(x, params):
    """ResNet Bottleneck forward (eval-mode BN, stride=1, groups=1, dilation=1, no downsample)."""
    eps = 1e-5  # nn.BatchNorm2d default
    n, c_in, h, w_img = x.shape
    hw = h * w_img
    x_flat = x.reshape(n, c_in, hw)

    # conv1 (1x1) + bn1
    w1 = params["conv1_w"][:, :, 0, 0]                        # (width, inplanes)
    width = w1.shape[0]
    w1f, s1 = _fold_bn(w1, params["bn1_gamma"], params["bn1_beta"],
                       params["bn1_mean"], params["bn1_var"], eps)

    # conv2 (3x3) + bn2: per-tap (O, I) weights with the BN scale folded in
    w2_taps = jnp.transpose(params["conv2_w"], (2, 3, 0, 1)).reshape(9, width, width)
    scale2 = params["bn2_gamma"] / jnp.sqrt(params["bn2_var"] + eps)
    w2_taps = w2_taps * scale2[None, :, None]
    s2 = (params["bn2_beta"] - params["bn2_mean"] * scale2)[:, None]

    # conv3 (1x1) + bn3
    w3 = params["conv3_w"][:, :, 0, 0]                        # (planes*4, width)
    c_out = w3.shape[0]
    w3f, s3 = _fold_bn(w3, params["bn3_gamma"], params["bn3_beta"],
                       params["bn3_mean"], params["bn3_var"], eps)

    if c_out != c_in:
        # TODO(synk): downsample / projection shortcut not implemented.
        raise NotImplementedError("identity shortcut requires inplanes == planes * expansion")

    itemsize = jnp.dtype(x.dtype).itemsize
    if _vmem_workset_bytes(c_in, width, c_out, hw, itemsize) > _VMEM_WORKSET_BUDGET:
        # TODO(synk): row-tiled (halo) variant for very large C*H*W images.
        raise NotImplementedError("fused Bottleneck working set exceeds the VMEM budget")

    masks = _conv2_tap_masks(h, w_img, x.dtype)               # (9, 1, HW), trace-time constant

    out_flat = pl.pallas_call(
        functools.partial(_fused_bottleneck_kernel, w_img=w_img),
        out_shape=jax.ShapeDtypeStruct((n, c_out, hw), x.dtype),
        grid_spec=pltpu.PrefetchScalarGridSpec(
            num_scalar_prefetch=0,
            grid=(n,),
            in_specs=[
                pl.BlockSpec((1, c_in, hw), lambda i: (i, 0, 0)),        # x / identity
                pl.BlockSpec((width, c_in), lambda i: (0, 0)),           # w1 (BN folded)
                pl.BlockSpec((width, 1), lambda i: (0, 0)),              # bn1 shift
                pl.BlockSpec((9, width, width), lambda i: (0, 0, 0)),    # w2 taps (BN folded)
                pl.BlockSpec((width, 1), lambda i: (0, 0)),              # bn2 shift
                pl.BlockSpec((c_out, width), lambda i: (0, 0)),          # w3 (BN folded)
                pl.BlockSpec((c_out, 1), lambda i: (0, 0)),              # bn3 shift
                pl.BlockSpec((9, 1, hw), lambda i: (0, 0, 0)),           # conv2 tap masks
            ],
            out_specs=pl.BlockSpec((1, c_out, hw), lambda i: (i, 0, 0)),
        ),
        compiler_params=pltpu.CompilerParams(
            dimension_semantics=("parallel",),
            vmem_limit_bytes=_VMEM_LIMIT_BYTES,
        ),
    )(x_flat, w1f, s1, w2_taps, s2, w3f, s3, masks)

    return out_flat.reshape(n, c_out, h, w_img)


if __name__ == "__main__":
    key = jax.random.PRNGKey(0)
    n, planes, h, wd = 2, 4, 16, 16
    expansion = 4
    inplanes = planes * expansion        # identity shortcut applies (no downsample)
    width = planes                       # base_width=64, groups=1 -> width = planes

    ks = jax.random.split(key, 16)

    def rnd(k, shape, s=0.1):
        return s * jax.random.normal(k, shape, dtype=jnp.float32)

    x = jax.random.normal(ks[0], (n, inplanes, h, wd), dtype=jnp.float32)
    params = {
        "conv1_w": rnd(ks[1], (width, inplanes, 1, 1)),
        "bn1_gamma": 1.0 + rnd(ks[2], (width,)),
        "bn1_beta": rnd(ks[3], (width,)),
        "bn1_mean": rnd(ks[4], (width,)),
        "bn1_var": jnp.abs(1.0 + rnd(ks[5], (width,))),
        "conv2_w": rnd(ks[6], (width, width, 3, 3)),
        "bn2_gamma": 1.0 + rnd(ks[7], (width,)),
        "bn2_beta": rnd(ks[8], (width,)),
        "bn2_mean": rnd(ks[9], (width,)),
        "bn2_var": jnp.abs(1.0 + rnd(ks[10], (width,))),
        "conv3_w": rnd(ks[11], (planes * expansion, width, 1, 1)),
        "bn3_gamma": 1.0 + rnd(ks[12], (planes * expansion,)),
        "bn3_beta": rnd(ks[13], (planes * expansion,)),
        "bn3_mean": rnd(ks[14], (planes * expansion,)),
        "bn3_var": jnp.abs(1.0 + rnd(ks[15], (planes * expansion,))),
    }

    out = bottleneck_forward(x, params)
    out = jax.block_until_ready(out)

    # Plain-JAX reference (eval-mode BN), computed at HIGHEST precision; the kernel uses
    # default MXU precision (f32 accumulation), hence the relaxed tolerance.
    def bn(y, g, b, m, v):
        s = g / jnp.sqrt(v + 1e-5)
        return y * s[None, :, None, None] + (b - m * s)[None, :, None, None]

    hp = jax.lax.Precision.HIGHEST
    r = jnp.einsum("nchw,oc->nohw", x, params["conv1_w"][:, :, 0, 0], precision=hp)
    r = jnp.maximum(bn(r, params["bn1_gamma"], params["bn1_beta"],
                       params["bn1_mean"], params["bn1_var"]), 0.0)
    r = jax.lax.conv_general_dilated(r, params["conv2_w"], (1, 1), ((1, 1), (1, 1)),
                                     dimension_numbers=("NCHW", "OIHW", "NCHW"),
                                     precision=hp)
    r = jnp.maximum(bn(r, params["bn2_gamma"], params["bn2_beta"],
                       params["bn2_mean"], params["bn2_var"]), 0.0)
    r = jnp.einsum("nchw,oc->nohw", r, params["conv3_w"][:, :, 0, 0], precision=hp)
    r = bn(r, params["bn3_gamma"], params["bn3_beta"],
           params["bn3_mean"], params["bn3_var"])
    ref = jnp.maximum(r + x, 0.0)

    assert out.shape == (n, planes * expansion, h, wd)
    err = float(jnp.max(jnp.abs(out - ref)))
    assert jnp.allclose(out, ref, atol=2e-2, rtol=2e-2), err

    print("KERNEL_OK")
</pallas_src>

<mosaic_0001>
module attributes {stable_mosaic.version = 11 : i64} {
  func.func @_fused_bottleneck_kernel(%arg0: i32, %arg1: memref<1x16x256xf32, #tpu.memory_space<vmem>>, %arg2: memref<4x16xf32, #tpu.memory_space<vmem>>, %arg3: memref<4x1xf32, #tpu.memory_space<vmem>>, %arg4: memref<9x4x4xf32, #tpu.memory_space<vmem>>, %arg5: memref<4x1xf32, #tpu.memory_space<vmem>>, %arg6: memref<16x4xf32, #tpu.memory_space<vmem>>, %arg7: memref<16x1xf32, #tpu.memory_space<vmem>>, %arg8: memref<9x1x256xf32, #tpu.memory_space<vmem>>, %arg9: memref<1x16x256xf32, #tpu.memory_space<vmem>>) attributes {dimension_semantics = [#tpu.dimension_semantics<parallel>], iteration_bounds = array<i64: 2>, scalar_prefetch = 0 : i64, scratch_operands = 0 : i64, tpu.core_type = #tpu.core_type<tc>, window_params = [{transform_indices = @transform_0, window_bounds = array<i64: 1, 16, 256>}, {pipeline_mode = #tpu.pipeline_mode<synchronous>, transform_indices = @transform_1, window_bounds = array<i64: 4, 16>}, {pipeline_mode = #tpu.pipeline_mode<synchronous>, transform_indices = @transform_2, window_bounds = array<i64: 4, 1>}, {pipeline_mode = #tpu.pipeline_mode<synchronous>, transform_indices = @transform_3, window_bounds = array<i64: 9, 4, 4>}, {pipeline_mode = #tpu.pipeline_mode<synchronous>, transform_indices = @transform_4, window_bounds = array<i64: 4, 1>}, {pipeline_mode = #tpu.pipeline_mode<synchronous>, transform_indices = @transform_5, window_bounds = array<i64: 16, 4>}, {pipeline_mode = #tpu.pipeline_mode<synchronous>, transform_indices = @transform_6, window_bounds = array<i64: 16, 1>}, {pipeline_mode = #tpu.pipeline_mode<synchronous>, transform_indices = @transform_7, window_bounds = array<i64: 9, 1, 256>}, {transform_indices = @transform_8, window_bounds = array<i64: 1, 16, 256>}]} {
    %c0 = arith.constant 0 : index
    %c0_0 = arith.constant 0 : index
    %c0_1 = arith.constant 0 : index
    %0 = vector.load %arg1[%c0, %c0_0, %c0_1] : memref<1x16x256xf32, #tpu.memory_space<vmem>>, vector<1x16x256xf32>
    %1 = vector.shape_cast %0 : vector<1x16x256xf32> to vector<16x256xf32>
    %c0_2 = arith.constant 0 : index
    %c0_3 = arith.constant 0 : index
    %2 = vector.load %arg2[%c0_2, %c0_3] : memref<4x16xf32, #tpu.memory_space<vmem>>, vector<4x16xf32>
    %cst = arith.constant dense<0.000000e+00> : vector<4x256xf32>
    %3 = tpu.matmul %2, %1, %cst {dimension_numbers = #tpu.dot_dimension_numbers<[1], [0], [0], [1], [0, 0, 1, 1], [], []>} : vector<4x16xf32>, vector<16x256xf32>, vector<4x256xf32> -> vector<4x256xf32>
    %c0_4 = arith.constant 0 : index
    %c0_5 = arith.constant 0 : index
    %4 = vector.load %arg3[%c0_4, %c0_5] : memref<4x1xf32, #tpu.memory_space<vmem>>, vector<4x1xf32>
    %5 = vector.broadcast %4 : vector<4x1xf32> to vector<4x256xf32>
    %6 = arith.addf %3, %5 : vector<4x256xf32>
    %cst_6 = arith.constant 0.000000e+00 : f32
    %7 = vector.broadcast %cst_6 : f32 to vector<4x256xf32>
    %8 = arith.maximumf %6, %7 : vector<4x256xf32>
    %cst_7 = arith.constant 0.000000e+00 : f32
    %9 = vector.broadcast %cst_7 : f32 to vector<4x256xf32>
    %c17_i32 = arith.constant 17 : i32
    %10 = tpu.dynamic_rotate %8 by %c17_i32 dim 1 : vector<4x256xf32>, i32 -> vector<4x256xf32>
    %c0_8 = arith.constant 0 : index
    %c0_9 = arith.constant 0 : index
    %c0_10 = arith.constant 0 : index
    %11 = vector.load %arg8[%c0_8, %c0_9, %c0_10] : memref<9x1x256xf32, #tpu.memory_space<vmem>>, vector<1x1x256xf32>
    %12 = vector.shape_cast %11 : vector<1x1x256xf32> to vector<1x256xf32>
    %13 = vector.broadcast %12 : vector<1x256xf32> to vector<4x256xf32>
    %14 = arith.mulf %10, %13 : vector<4x256xf32>
    %c0_11 = arith.constant 0 : index
    %c0_12 = arith.constant 0 : index
    %c0_13 = arith.constant 0 : index
    %15 = vector.load %arg4[%c0_11, %c0_12, %c0_13] : memref<9x4x4xf32, #tpu.memory_space<vmem>>, vector<1x4x4xf32>
    %16 = vector.shape_cast %15 : vector<1x4x4xf32> to vector<4x4xf32>
    %cst_14 = arith.constant dense<0.000000e+00> : vector<4x256xf32>
    %17 = tpu.matmul %16, %14, %cst_14 {dimension_numbers = #tpu.dot_dimension_numbers<[1], [0], [0], [1], [0, 0, 1, 1], [], []>} : vector<4x4xf32>, vector<4x256xf32>, vector<4x256xf32> -> vector<4x256xf32>
    %18 = arith.addf %9, %17 : vector<4x256xf32>
    %c16_i32 = arith.constant 16 : i32
    %19 = tpu.dynamic_rotate %8 by %c16_i32 dim 1 : vector<4x256xf32>, i32 -> vector<4x256xf32>
    %c1 = arith.constant 1 : index
    %c0_15 = arith.constant 0 : index
    %c0_16 = arith.constant 0 : index
    %20 = vector.load %arg8[%c1, %c0_15, %c0_16] : memref<9x1x256xf32, #tpu.memory_space<vmem>>, vector<1x1x256xf32>
    %21 = vector.shape_cast %20 : vector<1x1x256xf32> to vector<1x256xf32>
    %22 = vector.broadcast %21 : vector<1x256xf32> to vector<4x256xf32>
    %23 = arith.mulf %19, %22 : vector<4x256xf32>
    %c1_17 = arith.constant 1 : index
    %c0_18 = arith.constant 0 : index
    %c0_19 = arith.constant 0 : index
    %24 = vector.load %arg4[%c1_17, %c0_18, %c0_19] : memref<9x4x4xf32, #tpu.memory_space<vmem>>, vector<1x4x4xf32>
    %25 = vector.shape_cast %24 : vector<1x4x4xf32> to vector<4x4xf32>
    %cst_20 = arith.constant dense<0.000000e+00> : vector<4x256xf32>
    %26 = tpu.matmul %25, %23, %cst_20 {dimension_numbers = #tpu.dot_dimension_numbers<[1], [0], [0], [1], [0, 0, 1, 1], [], []>} : vector<4x4xf32>, vector<4x256xf32>, vector<4x256xf32> -> vector<4x256xf32>
    %27 = arith.addf %18, %26 : vector<4x256xf32>
    %c15_i32 = arith.constant 15 : i32
    %28 = tpu.dynamic_rotate %8 by %c15_i32 dim 1 : vector<4x256xf32>, i32 -> vector<4x256xf32>
    %c2 = arith.constant 2 : index
    %c0_21 = arith.constant 0 : index
    %c0_22 = arith.constant 0 : index
    %29 = vector.load %arg8[%c2, %c0_21, %c0_22] : memref<9x1x256xf32, #tpu.memory_space<vmem>>, vector<1x1x256xf32>
    %30 = vector.shape_cast %29 : vector<1x1x256xf32> to vector<1x256xf32>
    %31 = vector.broadcast %30 : vector<1x256xf32> to vector<4x256xf32>
    %32 = arith.mulf %28, %31 : vector<4x256xf32>
    %c2_23 = arith.constant 2 : index
    %c0_24 = arith.constant 0 : index
    %c0_25 = arith.constant 0 : index
    %33 = vector.load %arg4[%c2_23, %c0_24, %c0_25] : memref<9x4x4xf32, #tpu.memory_space<vmem>>, vector<1x4x4xf32>
    %34 = vector.shape_cast %33 : vector<1x4x4xf32> to vector<4x4xf32>
    %cst_26 = arith.constant dense<0.000000e+00> : vector<4x256xf32>
    %35 = tpu.matmul %34, %32, %cst_26 {dimension_numbers = #tpu.dot_dimension_numbers<[1], [0], [0], [1], [0, 0, 1, 1], [], []>} : vector<4x4xf32>, vector<4x256xf32>, vector<4x256xf32> -> vector<4x256xf32>
    %36 = arith.addf %27, %35 : vector<4x256xf32>
    %c1_i32 = arith.constant 1 : i32
    %37 = tpu.dynamic_rotate %8 by %c1_i32 dim 1 : vector<4x256xf32>, i32 -> vector<4x256xf32>
    %c3 = arith.constant 3 : index
    %c0_27 = arith.constant 0 : index
    %c0_28 = arith.constant 0 : index
    %38 = vector.load %arg8[%c3, %c0_27, %c0_28] : memref<9x1x256xf32, #tpu.memory_space<vmem>>, vector<1x1x256xf32>
    %39 = vector.shape_cast %38 : vector<1x1x256xf32> to vector<1x256xf32>
    %40 = vector.broadcast %39 : vector<1x256xf32> to vector<4x256xf32>
    %41 = arith.mulf %37, %40 : vector<4x256xf32>
    %c3_29 = arith.constant 3 : index
    %c0_30 = arith.constant 0 : index
    %c0_31 = arith.constant 0 : index
    %42 = vector.load %arg4[%c3_29, %c0_30, %c0_31] : memref<9x4x4xf32, #tpu.memory_space<vmem>>, vector<1x4x4xf32>
    %43 = vector.shape_cast %42 : vector<1x4x4xf32> to vector<4x4xf32>
    %cst_32 = arith.constant dense<0.000000e+00> : vector<4x256xf32>
    %44 = tpu.matmul %43, %41, %cst_32 {dimension_numbers = #tpu.dot_dimension_numbers<[1], [0], [0], [1], [0, 0, 1, 1], [], []>} : vector<4x4xf32>, vector<4x256xf32>, vector<4x256xf32> -> vector<4x256xf32>
    %45 = arith.addf %36, %44 : vector<4x256xf32>
    %c4 = arith.constant 4 : index
    %c0_33 = arith.constant 0 : index
    %c0_34 = arith.constant 0 : index
    %46 = vector.load %arg4[%c4, %c0_33, %c0_34] : memref<9x4x4xf32, #tpu.memory_space<vmem>>, vector<1x4x4xf32>
    %47 = vector.shape_cast %46 : vector<1x4x4xf32> to vector<4x4xf32>
    %cst_35 = arith.constant dense<0.000000e+00> : vector<4x256xf32>
    %48 = tpu.matmul %47, %8, %cst_35 {dimension_numbers = #tpu.dot_dimension_numbers<[1], [0], [0], [1], [0, 0, 1, 1], [], []>} : vector<4x4xf32>, vector<4x256xf32>, vector<4x256xf32> -> vector<4x256xf32>
    %49 = arith.addf %45, %48 : vector<4x256xf32>
    %c255_i32 = arith.constant 255 : i32
    %50 = tpu.dynamic_rotate %8 by %c255_i32 dim 1 : vector<4x256xf32>, i32 -> vector<4x256xf32>
    %c5 = arith.constant 5 : index
    %c0_36 = arith.constant 0 : index
    %c0_37 = arith.constant 0 : index
    %51 = vector.load %arg8[%c5, %c0_36, %c0_37] : memref<9x1x256xf32, #tpu.memory_space<vmem>>, vector<1x1x256xf32>
    %52 = vector.shape_cast %51 : vector<1x1x256xf32> to vector<1x256xf32>
    %53 = vector.broadcast %52 : vector<1x256xf32> to vector<4x256xf32>
    %54 = arith.mulf %50, %53 : vector<4x256xf32>
    %c5_38 = arith.constant 5 : index
    %c0_39 = arith.constant 0 : index
    %c0_40 = arith.constant 0 : index
    %55 = vector.load %arg4[%c5_38, %c0_39, %c0_40] : memref<9x4x4xf32, #tpu.memory_space<vmem>>, vector<1x4x4xf32>
    %56 = vector.shape_cast %55 : vector<1x4x4xf32> to vector<4x4xf32>
    %cst_41 = arith.constant dense<0.000000e+00> : vector<4x256xf32>
    %57 = tpu.matmul %56, %54, %cst_41 {dimension_numbers = #tpu.dot_dimension_numbers<[1], [0], [0], [1], [0, 0, 1, 1], [], []>} : vector<4x4xf32>, vector<4x256xf32>, vector<4x256xf32> -> vector<4x256xf32>
    %58 = arith.addf %49, %57 : vector<4x256xf32>
    %c241_i32 = arith.constant 241 : i32
    %59 = tpu.dynamic_rotate %8 by %c241_i32 dim 1 : vector<4x256xf32>, i32 -> vector<4x256xf32>
    %c6 = arith.constant 6 : index
    %c0_42 = arith.constant 0 : index
    %c0_43 = arith.constant 0 : index
    %60 = vector.load %arg8[%c6, %c0_42, %c0_43] : memref<9x1x256xf32, #tpu.memory_space<vmem>>, vector<1x1x256xf32>
    %61 = vector.shape_cast %60 : vector<1x1x256xf32> to vector<1x256xf32>
    %62 = vector.broadcast %61 : vector<1x256xf32> to vector<4x256xf32>
    %63 = arith.mulf %59, %62 : vector<4x256xf32>
    %c6_44 = arith.constant 6 : index
    %c0_45 = arith.constant 0 : index
    %c0_46 = arith.constant 0 : index
    %64 = vector.load %arg4[%c6_44, %c0_45, %c0_46] : memref<9x4x4xf32, #tpu.memory_space<vmem>>, vector<1x4x4xf32>
    %65 = vector.shape_cast %64 : vector<1x4x4xf32> to vector<4x4xf32>
    %cst_47 = arith.constant dense<0.000000e+00> : vector<4x256xf32>
    %66 = tpu.matmul %65, %63, %cst_47 {dimension_numbers = #tpu.dot_dimension_numbers<[1], [0], [0], [1], [0, 0, 1, 1], [], []>} : vector<4x4xf32>, vector<4x256xf32>, vector<4x256xf32> -> vector<4x256xf32>
    %67 = arith.addf %58, %66 : vector<4x256xf32>
    %c240_i32 = arith.constant 240 : i32
    %68 = tpu.dynamic_rotate %8 by %c240_i32 dim 1 : vector<4x256xf32>, i32 -> vector<4x256xf32>
    %c7 = arith.constant 7 : index
    %c0_48 = arith.constant 0 : index
    %c0_49 = arith.constant 0 : index
    %69 = vector.load %arg8[%c7, %c0_48, %c0_49] : memref<9x1x256xf32, #tpu.memory_space<vmem>>, vector<1x1x256xf32>
    %70 = vector.shape_cast %69 : vector<1x1x256xf32> to vector<1x256xf32>
    %71 = vector.broadcast %70 : vector<1x256xf32> to vector<4x256xf32>
    %72 = arith.mulf %68, %71 : vector<4x256xf32>
    %c7_50 = arith.constant 7 : index
    %c0_51 = arith.constant 0 : index
    %c0_52 = arith.constant 0 : index
    %73 = vector.load %arg4[%c7_50, %c0_51, %c0_52] : memref<9x4x4xf32, #tpu.memory_space<vmem>>, vector<1x4x4xf32>
    %74 = vector.shape_cast %73 : vector<1x4x4xf32> to vector<4x4xf32>
    %cst_53 = arith.constant dense<0.000000e+00> : vector<4x256xf32>
    %75 = tpu.matmul %74, %72, %cst_53 {dimension_numbers = #tpu.dot_dimension_numbers<[1], [0], [0], [1], [0, 0, 1, 1], [], []>} : vector<4x4xf32>, vector<4x256xf32>, vector<4x256xf32> -> vector<4x256xf32>
    %76 = arith.addf %67, %75 : vector<4x256xf32>
    %c239_i32 = arith.constant 239 : i32
    %77 = tpu.dynamic_rotate %8 by %c239_i32 dim 1 : vector<4x256xf32>, i32 -> vector<4x256xf32>
    %c8 = arith.constant 8 : index
    %c0_54 = arith.constant 0 : index
    %c0_55 = arith.constant 0 : index
    %78 = vector.load %arg8[%c8, %c0_54, %c0_55] : memref<9x1x256xf32, #tpu.memory_space<vmem>>, vector<1x1x256xf32>
    %79 = vector.shape_cast %78 : vector<1x1x256xf32> to vector<1x256xf32>
    %80 = vector.broadcast %79 : vector<1x256xf32> to vector<4x256xf32>
    %81 = arith.mulf %77, %80 : vector<4x256xf32>
    %c8_56 = arith.constant 8 : index
    %c0_57 = arith.constant 0 : index
    %c0_58 = arith.constant 0 : index
    %82 = vector.load %arg4[%c8_56, %c0_57, %c0_58] : memref<9x4x4xf32, #tpu.memory_space<vmem>>, vector<1x4x4xf32>
    %83 = vector.shape_cast %82 : vector<1x4x4xf32> to vector<4x4xf32>
    %cst_59 = arith.constant dense<0.000000e+00> : vector<4x256xf32>
    %84 = tpu.matmul %83, %81, %cst_59 {dimension_numbers = #tpu.dot_dimension_numbers<[1], [0], [0], [1], [0, 0, 1, 1], [], []>} : vector<4x4xf32>, vector<4x256xf32>, vector<4x256xf32> -> vector<4x256xf32>
    %85 = arith.addf %76, %84 : vector<4x256xf32>
    %c0_60 = arith.constant 0 : index
    %c0_61 = arith.constant 0 : index
    %86 = vector.load %arg5[%c0_60, %c0_61] : memref<4x1xf32, #tpu.memory_space<vmem>>, vector<4x1xf32>
    %87 = vector.broadcast %86 : vector<4x1xf32> to vector<4x256xf32>
    %88 = arith.addf %85, %87 : vector<4x256xf32>
    %cst_62 = arith.constant 0.000000e+00 : f32
    %89 = vector.broadcast %cst_62 : f32 to vector<4x256xf32>
    %90 = arith.maximumf %88, %89 : vector<4x256xf32>
    %c0_63 = arith.constant 0 : index
    %c0_64 = arith.constant 0 : index
    %91 = vector.load %arg6[%c0_63, %c0_64] : memref<16x4xf32, #tpu.memory_space<vmem>>, vector<16x4xf32>
    %cst_65 = arith.constant dense<0.000000e+00> : vector<16x256xf32>
    %92 = tpu.matmul %91, %90, %cst_65 {dimension_numbers = #tpu.dot_dimension_numbers<[1], [0], [0], [1], [0, 0, 1, 1], [], []>} : vector<16x4xf32>, vector<4x256xf32>, vector<16x256xf32> -> vector<16x256xf32>
    %c0_66 = arith.constant 0 : index
    %c0_67 = arith.constant 0 : index
    %93 = vector.load %arg7[%c0_66, %c0_67] : memref<16x1xf32, #tpu.memory_space<vmem>>, vector<16x1xf32>
    %94 = vector.broadcast %93 : vector<16x1xf32> to vector<16x256xf32>
    %95 = arith.addf %92, %94 : vector<16x256xf32>
    %96 = arith.addf %95, %1 : vector<16x256xf32>
    %cst_68 = arith.constant 0.000000e+00 : f32
    %97 = vector.broadcast %cst_68 : f32 to vector<16x256xf32>
    %98 = arith.maximumf %96, %97 : vector<16x256xf32>
    %c0_69 = arith.constant 0 : index
    %c0_70 = arith.constant 0 : index
    %c0_71 = arith.constant 0 : index
    %99 = vector.load %arg9[%c0_69, %c0_70, %c0_71] : memref<1x16x256xf32, #tpu.memory_space<vmem>>, vector<1x16x256xf32>
    %100 = vector.shape_cast %99 : vector<1x16x256xf32> to vector<16x256xf32>
    %101 = vector.shape_cast %98 : vector<16x256xf32> to vector<1x16x256xf32>
    tpu.vector_store %arg9[%c0_69, %c0_70, %c0_71], %101 {strides = array<i32>} : memref<1x16x256xf32, #tpu.memory_space<vmem>>, vector<1x16x256xf32>,
    return
  }
  func.func @transform_0(%arg0: i32) -> (i32, i32, i32) {
    %c0_i32 = arith.constant 0 : i32
    %c0_i32_0 = arith.constant 0 : i32
    %c0_i32_1 = arith.constant 0 : i32
    return %arg0, %c0_i32, %c0_i32_0 : i32, i32, i32
  }
  func.func @transform_1(%arg0: i32) -> (i32, i32) {
    %c0_i32 = arith.constant 0 : i32
    %c0_i32_0 = arith.constant 0 : i32
    %c0_i32_1 = arith.constant 0 : i32
    return %c0_i32, %c0_i32_0 : i32, i32
  }
  func.func @transform_2(%arg0: i32) -> (i32, i32) {
    %c0_i32 = arith.constant 0 : i32
    %c0_i32_0 = arith.constant 0 : i32
    %c0_i32_1 = arith.constant 0 : i32
    return %c0_i32, %c0_i32_0 : i32, i32
  }
  func.func @transform_3(%arg0: i32) -> (i32, i32, i32) {
    %c0_i32 = arith.constant 0 : i32
    %c0_i32_0 = arith.constant 0 : i32
    %c0_i32_1 = arith.constant 0 : i32
    %c0_i32_2 = arith.constant 0 : i32
    return %c0_i32, %c0_i32_0, %c0_i32_1 : i32, i32, i32
  }
  func.func @transform_4(%arg0: i32) -> (i32, i32) {
    %c0_i32 = arith.constant 0 : i32
    %c0_i32_0 = arith.constant 0 : i32
    %c0_i32_1 = arith.constant 0 : i32
    return %c0_i32, %c0_i32_0 : i32, i32
  }
  func.func @transform_5(%arg0: i32) -> (i32, i32) {
    %c0_i32 = arith.constant 0 : i32
    %c0_i32_0 = arith.constant 0 : i32
    %c0_i32_1 = arith.constant 0 : i32
    return %c0_i32, %c0_i32_0 : i32, i32
  }
  func.func @transform_6(%arg0: i32) -> (i32, i32) {
    %c0_i32 = arith.constant 0 : i32
    %c0_i32_0 = arith.constant 0 : i32
    %c0_i32_1 = arith.constant 0 : i32
    return %c0_i32, %c0_i32_0 : i32, i32
  }
  func.func @transform_7(%arg0: i32) -> (i32, i32, i32) {
    %c0_i32 = arith.constant 0 : i32
    %c0_i32_0 = arith.constant 0 : i32
    %c0_i32_1 = arith.constant 0 : i32
    %c0_i32_2 = arith.constant 0 : i32
    return %c0_i32, %c0_i32_0, %c0_i32_1 : i32, i32, i32
  }
  func.func @transform_8(%arg0: i32) -> (i32, i32, i32) {
    %c0_i32 = arith.constant 0 : i32
    %c0_i32_0 = arith.constant 0 : i32
    %c0_i32_1 = arith.constant 0 : i32
    return %arg0, %c0_i32, %c0_i32_0 : i32, i32, i32
  }
}

</mosaic_0001>

<bundles_post_ra>
// kernel: bottleneck_forward.1
= control target key start
LH: loop header
LB: loop body
LE: loop exit
PB: predicated region body
PF: predicated region fallthrough
CT: control target
= control target key end

     0   :  { %s1667_s27 = smov 0   ;;  %s1879_s0 = inlined_call_operand.vmem [shape: f32[2,16,256], index: 0, kind: input, shape index: {}]   ;;  %s1880_s1 = inlined_call_operand.vmem [shape: f32[4,16], index: 1, kind: input, shape index: {}]   ;;  %s1881_s2 = inlined_call_operand.vmem [shape: f32[4,1], index: 2, kind: input, shape index: {}]   ;;  %s1882_s3 = inlined_call_operand.vmem [shape: f32[9,4,4], index: 3, kind: input, shape index: {}]   ;;  %s1883_s4 = inlined_call_operand.vmem [shape: f32[4,1], index: 4, kind: input, shape index: {}]   ;;  %s1884_s5 = inlined_call_operand.vmem [shape: f32[16,4], index: 5, kind: input, shape index: {}]   ;;  %s1885_s6 = inlined_call_operand.vmem [shape: f32[16,1], index: 6, kind: input, shape index: {}]   ;;  %s1886_s7 = inlined_call_operand.vmem [shape: f32[9,1,256], index: 7, kind: input, shape index: {}]   ;;  %s1887_s8 = inlined_call_operand.vmem [shape: f32[2,16,256], index: 8, kind: output, shape index: {}]  }
   0x1 LB: > { %s1504_s28 = sadd.s32 4294967295, %s1610_s27   ;;  %p1508_p0 = scmp.ge.s32.totalorder %s1610_s27, 1  ;;  %s1610_s27 = sphi %s1667_s27, %s18_s27  }
   0x2   : > { %p262_p1 = scmp.lt.s32.totalorder %s1610_s27, 3 }
   0x4   : > { %p263_p2 = pnand %p1508_p0, %p262_p1 }
   0x5   : > { %p296_p3 = scmp.lt.s32.totalorder (!%p263_p2), %s1504_s28, 1  ;;  %v1612_v0 = vmov (!%p263_p2), 0.0   ;;  %v1613_v1 = vmov (!%p263_p2), 0   ;;  %v311_v2 = vld [vmem:[%s1881_s2] sm:$0xf] (!%p263_p2)  ;;  %vm317_vm0 = vcmask (!%p263_p2), 130048   ;;  %v398_v20 = vlaneseq (!%p263_p2) }
   0x6   : > { %266 = sbr.rel (%p263_p2) target bundleno = 845 (0x34d), region = 52  ;;  %385 = vmatprep.mubr.f32.mxu0 (!%p263_p2), %v1612_v0  ;;  %1602 = vset.pattern.permute.xlu0 (!%p263_p2), %v1613_v1  ;;  %v310_v9 = vld [vmem:[%s1880_s1] sm:$0xf] (!%p263_p2)  ;;  %s1614_s15 = smov (!%p263_p2), 1   ;;  %v1337_v19 = vld [vmem:[%s1885_s6 + $0x8] sm:$0xff] (!%p263_p2)  ;;  %vm446_vm2 = vcmask (!%p263_p2), 1043456  }
   0x7   : > { %314 = vperm.xlu0 (!%p263_p2), %1602, %v311_v2   ;;  %807 = vmatprep.mubr.f32.mxu1 (!%p263_p2), %v1612_v0  ;;  %s1615_s16 = smov (!%p263_p2), 127   ;;  %s1616_s17 = smov (!%p263_p2), 16   ;;  %v1336_v17 = vld [vmem:[%s1885_s6] sm:$0xff] (!%p263_p2)  ;;  %v406_v21 = vshrl.u32 (!%p263_p2), %v398_v20, 7  ;;  %v1723_v22 = vand.u32 (!%p263_p2), 127, %v398_v20  ;;  %vm442_vm4 = vcmask (!%p263_p2), 31744  }
   0x8   : > { %1603 = vset.pattern.permute.xlu1 (!%p263_p2), %v1613_v1  ;;  %s1617_s18 = smov (!%p263_p2), 113   ;;  %s1618_s19 = smov (!%p263_p2), 17   ;;  %v1324_v18 = vld [vmem:[%s1883_s4] sm:$0xf] (!%p263_p2)  ;;  %v1527_v25 = vld [vmem:[%s1886_s7 + $0x6] sm:$0x3] (!%p263_p2) }
   0x9   : > { %s1619_s20 = smov (!%p263_p2), 112   ;;  %s1620_s21 = smov (!%p263_p2), 15   ;;  %v1725_v23 = vsub.s32 (!%p263_p2), 0, %v406_v21  ;;  %v1727_v24 = vsub.s32 (!%p263_p2), 1, %v406_v21  ;;  %vm714_vm1 = vcmp.lt.s32.totalorder (!%p263_p2), %v1723_v22, 1  ;;  %vm904_vm3 = vcmp.lt.s32.totalorder (!%p263_p2), %v1723_v22, 127 }
   0xa   : > { %s1621_s22 = smov (!%p263_p2), 111   ;;  %v1536_v29 = vld [vmem:[%s1886_s7 + $0xa] sm:$0x3] (!%p263_p2)  ;;  %v1528_v37 = vld [vmem:[%s1882_s3 + $0xc] sm:$0xf] (!%p263_p2)  ;;  %vm422_vm5 = vcmp.lt.s32.totalorder (!%p263_p2), %v1723_v22, 16 }
   0xb   : > { %v723_v26 = vrot.slane (!%p263_p2), %v1527_v25, %v1725_v23  ;;  %v727_v27 = vrot.slane (!%p263_p2), %v1527_v25, %v1727_v24  ;;  %v917_v34 = vrot.slane (!%p263_p2), %v1536_v29, %v1727_v24  ;;  %v1514_v38 = vld [vmem:[%s1886_s7 + $0x2] sm:$0x3] (!%p263_p2)  ;;  %v1541_v45 = vld [vmem:[%s1886_s7 + $0xc] sm:$0x3] (!%p263_p2)  ;;  %v913_v47 = vrot.slane (!%p263_p2), %v1536_v29, %v1725_v23  ;;  %v1515_v55 = vld [vmem:[%s1882_s3 + $0x4] sm:$0xf] (!%p263_p2) }
   0xc   : > { %v431_v42 = vrot.slane (!%p263_p2), %v1514_v38, %v1725_v23  ;;  %v435_v43 = vrot.slane (!%p263_p2), %v1514_v38, %v1727_v24  ;;  %vm1010_vm6 = vcmp.lt.s32.totalorder (!%p263_p2), %v1723_v22, 113  ;;  %v1023_v53 = vrot.slane (!%p263_p2), %v1541_v45, %v1727_v24  ;;  %v1532_v56 = vld [vmem:[%s1882_s3 + $0x10] sm:$0xf] (!%p263_p2)  ;;  %v403_v57 = vld [vmem:[%s1886_s7] sm:$0x3] (!%p263_p2) }
   0xd   : > { %s1889_s28 = smov (!%p296_p3, %s1504_s28), 1  ;;  %vm400_vm7 = vcmp.lt.s32.totalorder %v1723_v22, 17  ;;  %v408_v62 = vrot.slane %v403_v57, %v1725_v23  ;;  %v412_v63 = vrot.slane %v403_v57, %v1727_v24  ;;  %v1546_v2 = vld [vmem:[%s1886_s7 + $0xe] sm:$0x3]  ;;  %vm1116_vm8 = vcmp.lt.s32.totalorder %v1723_v22, 112 }
   0xe   : > { %s1562_s9 = sshll.u32 %s1889_s28, 5  ;;  %vm608_vm9 = vcmp.lt.s32.totalorder %v1723_v22, 15  ;;  %v1551_v29 = vld [vmem:[%s1886_s7 + $0x10] sm:$0x3]  ;;  %vm1222_vm10 = vcmp.lt.s32.totalorder %v1723_v22, 111 }
   0xf   : > { %s300_s12 = scalar_lea.vmem %s1879_s0, %s1562_s9 }
  0x10   : > { %v1688_v3 = vld [vmem:[%s300_s12 + $0x8] sm:$0xff]  ;;  %v1690_v4 = vld [vmem:[%s300_s12 + $0x18] sm:$0xff]  ;;  %v1692_v5 = vld [vmem:[%s300_s12] sm:$0xff] }
  0x11   : > { %v1564_v6 = vpack.c.bf16 %v1690_v4, %v1688_v3  ;;  %v1696_v7 = vld [vmem:[%s300_s12 + $0x10] sm:$0xff]  ;;  %s305_s12 = scalar_lea.vmem %s1887_s8, %s1562_s9 }
  0x12   : > { %v1566_v8 = vpack.c.bf16 %v1696_v7, %v1692_v5 }
  0x13   : > { %1565 = vmatprep.subr.bf16.mxu0 %v1564_v6 }
  0x14   : > { %1567 = vmatpush1.bf16.msra.mxu0 %v1566_v8  ;;  %v1019_v8 = vrot.slane %v1541_v45, %v1725_v23 }
  0x17   : > { %1513 = vmatmul.mubr.msk.f32.vlgmr.msra.gmra.mrb[0].mxu0 %vm317_vm0, %v310_v9 }
  0x18   : > { %517 = vmatprep.mubr.f32.mxu0 %v1612_v0 }
  0x86   : > { %v315_v10 = vpop.permute.xlu0 %314 }
  0xea   : > { %v387_v11 = vpop.f32.mrb[0].mxu0 }
  0xeb   : > { %v388_v12 = vadd.f32 %v387_v11, %v315_v10  ;;  %v389_v13 = vpop.f32.mrb[1].mxu0 }
  0xec   : > { %v390_v14 = vadd.f32 %v389_v13, %v315_v10 }
  0xed   : > { %v1704_v15 = vmax.f32 %v388_v12, 0.0 }
  0xee   : > { %v393_v16 = vmax.f32 %v390_v14, 0.0  ;;  %v1129_v14 = vrot.slane %v1546_v2, %v1727_v24 }
  0xef   : > { %710 = vrot.lane.b32.xlu0 %v1704_v15, %s1614_s15 }
  0xf0   : > { %712 = vrot.lane.b32.xlu1 %v393_v16, %s1614_s15 }
  0xf3   : > { %902 = vrot.lane.b32.xlu0 %v393_v16, %s1615_s16 }
  0xf4   : > { %900 = vrot.lane.b32.xlu1 %v1704_v15, %s1615_s16 }
  0xf7   : > { %420 = vrot.lane.b32.xlu0 %v393_v16, %s1616_s17 }
  0xf8   : > { %418 = vrot.lane.b32.xlu1 %v1704_v15, %s1616_s17 }
  0xfb   : > { %1008 = vrot.lane.b32.xlu0 %v393_v16, %s1617_s18 }
  0xfc   : > { %1006 = vrot.lane.b32.xlu1 %v1704_v15, %s1617_s18 }
  0xff   : > { %396 = vrot.lane.b32.xlu0 %v393_v16, %s1618_s19 }
 0x100   : > { %394 = vrot.lane.b32.xlu1 %v1704_v15, %s1618_s19 }
 0x103   : > { %1114 = vrot.lane.b32.xlu0 %v393_v16, %s1619_s20 }
 0x104   : > { %1112 = vrot.lane.b32.xlu1 %v1704_v15, %s1619_s20 }
 0x107   : > { %606 = vrot.lane.b32.xlu0 %v393_v16, %s1620_s21 }
 0x108   : > { %604 = vrot.lane.b32.xlu1 %v1704_v15, %s1620_s21 }
 0x10b   : > { %1220 = vrot.lane.b32.xlu0 %v393_v16, %s1621_s22 }
 0x10c   : > { %1218 = vrot.lane.b32.xlu1 %v1704_v15, %s1621_s22 }
 0x10f   : > { %1340 = vperm.xlu0 %1602, %v1336_v17   ;;  %v1537_v17 = vld [vmem:[%s1882_s3 + $0x14] sm:$0xf] }
 0x110   : > { %1327 = vperm.xlu1 %1603, %v1324_v18   ;;  %v1522_v18 = vld [vmem:[%s1886_s7 + $0x4] sm:$0x3] }
 0x114   : > { %1345 = vperm.xlu1 %1603, %v1337_v19  }
 0x161   : > { %v711_v28 = vpop.permute.xlu0 %710 }
 0x162   : > { %v713_v30 = vpop.permute.xlu1 %712 }
 0x163   : > { %v715_v31 = vsel %vm714_vm1, %v711_v28, %v713_v30  ;;  %v716_v32 = vsel %vm714_vm1, %v713_v30, %v711_v28 }
 0x164   : > { %v730_v33 = vmul.f32 %v723_v26, %v716_v32  ;;  %v731_v35 = vmul.f32 %v727_v27, %v715_v31  ;;  %v617_v26 = vrot.slane %v1522_v18, %v1725_v23  ;;  %v621_v27 = vrot.slane %v1522_v18, %v1727_v24 }
 0x165   : > { %v903_v36 = vpop.permute.xlu0 %902  ;;  %v1125_v31 = vrot.slane %v1546_v2, %v1725_v23 }
 0x166   : > { %v901_v39 = vpop.permute.xlu1 %900  ;;  %1529 = vmatprep.subr.msk.mxu1 %vm446_vm2, %v731_v35 }
 0x167   : > { %v906_v40 = vsel %vm904_vm3, %v903_v36, %v901_v39  ;;  %1530 = vmatpush1.msk.msra.mxu1 %vm446_vm2, %v730_v33  ;;  %v905_v50 = vsel %vm904_vm3, %v901_v39, %v903_v36  ;;  %v1523_v39 = vld [vmem:[%s1882_s3 + $0x8] sm:$0xf] }
 0x168   : > { %v921_v41 = vmul.f32 %v917_v34, %v906_v40  ;;  %1531 = vmatmul.mubr.msk.f32.vlgmr.msra.gmra.mrb[0].mxu1 %vm442_vm4, %v1528_v37  ;;  %1533 = vmatprep.subr.msk.mxu1 %vm446_vm2, %v393_v16  ;;  %v920_v59 = vmul.f32 %v913_v47, %v905_v50  ;;  %v417_v16 = vld [vmem:[%s1882_s3] sm:$0xf]  ;;  %v1235_v37 = vrot.slane %v1551_v29, %v1727_v24  ;;  %v1542_v40 = vld [vmem:[%s1882_s3 + $0x18] sm:$0xf] }
 0x169   : > { %1534 = vmatpush1.msk.msra.mxu1 %vm446_vm2, %v1704_v15  ;;  %v421_v44 = vpop.permute.xlu0 %420  ;;  %891 = vmatprep.mubr.f32.mxu1 %v1612_v0  ;;  %v1231_v24 = vrot.slane %v1551_v29, %v1725_v23 }
 0x16a   : > { %v419_v46 = vpop.permute.xlu1 %418  ;;  %1538 = vmatprep.subr.msk.mxu1 %vm446_vm2, %v921_v41 }
 0x16b   : > { %v423_v48 = vsel %vm422_vm5, %v419_v46, %v421_v44  ;;  %v424_v49 = vsel %vm422_vm5, %v421_v44, %v419_v46  ;;  %v1547_v46 = vld [vmem:[%s1882_s3 + $0x1c] sm:$0xf] }
 0x16c   : > { %v438_v51 = vmul.f32 %v431_v42, %v424_v49  ;;  %v439_v52 = vmul.f32 %v435_v43, %v423_v48  ;;  %v1552_v48 = vld [vmem:[%s1882_s3 + $0x20] sm:$0xf] }
 0x16d   : > { %v1009_v54 = vpop.permute.xlu0 %1008 }
 0x16e   : > { %v1007_v58 = vpop.permute.xlu1 %1006  ;;  %1516 = vmatprep.subr.msk.mxu0 %vm446_vm2, %v439_v52 }
 0x16f   : > { %v1012_v60 = vsel %vm1010_vm6, %v1009_v54, %v1007_v58  ;;  %1517 = vmatpush1.msk.msra.mxu0 %vm446_vm2, %v438_v51  ;;  %v1011_v11 = vsel %vm1010_vm6, %v1007_v58, %v1009_v54  ;;  %v1334_v58 = vld [vmem:[%s1884_s5] sm:$0xff] }
 0x170   : > { %v1027_v61 = vmul.f32 %v1023_v53, %v1012_v60  ;;  %1518 = vmatmul.mubr.msk.f32.vlgmr.msra.gmra.mrb[2].mxu0 %vm442_vm4, %v1515_v55  ;;  %1535 = vmatmul.mubr.msk.f32.vlgmr.msra.gmra.mrb[0].mxu1 %vm442_vm4, %v1532_v56  ;;  %v1026_v20 = vmul.f32 %v1019_v8, %v1011_v11 }
 0x171   : > { %1539 = vmatpush1.msk.msra.mxu1 %vm446_vm2, %v920_v59  ;;  %v397_v1 = vpop.permute.xlu0 %396  ;;  %597 = vmatprep.mubr.f32.mxu0 %v1612_v0  ;;  %v1335_v59 = vld [vmem:[%s1884_s5 + $0x8] sm:$0xff] }
 0x172   : > { %v395_v6 = vpop.permute.xlu1 %394  ;;  %1543 = vmatprep.subr.msk.mxu1 %vm446_vm2, %v1027_v61  ;;  %997 = vmatprep.mubr.f32.mxu1 %v1612_v0 }
 0x173   : > { %v401_v9 = vsel %vm400_vm7, %v395_v6, %v397_v1  ;;  %v402_v10 = vsel %vm400_vm7, %v397_v1, %v395_v6 }
 0x174   : > { %v415_v12 = vmul.f32 %v408_v62, %v402_v10  ;;  %v416_v13 = vmul.f32 %v412_v63, %v401_v9 }
 0x175   : > { %v1115_v15 = vpop.permute.xlu0 %1114 }
 0x176   : > { %v1113_v19 = vpop.permute.xlu1 %1112  ;;  %1519 = vmatprep.subr.msk.mxu0 %vm446_vm2, %v416_v13 }
 0x177   : > { %v1118_v21 = vsel %vm1116_vm8, %v1115_v15, %v1113_v19  ;;  %1520 = vmatpush1.msk.msra.mxu0 %vm446_vm2, %v415_v12  ;;  %v1117_v34 = vsel %vm1116_vm8, %v1113_v19, %v1115_v15 }
 0x178   : > { %v1133_v25 = vmul.f32 %v1129_v14, %v1118_v21  ;;  %1521 = vmatmul.mubr.msk.f32.vlgmr.msra.gmra.mrb[2].mxu0 %vm442_vm4, %v417_v16  ;;  %1540 = vmatmul.mubr.msk.f32.vlgmr.msra.gmra.mrb[0].mxu1 %vm442_vm4, %v1537_v17  ;;  %v1132_v42 = vmul.f32 %v1125_v31, %v1117_v34 }
 0x179   : > { %1544 = vmatpush1.msk.msra.mxu1 %vm446_vm2, %v1026_v20  ;;  %v607_v28 = vpop.permute.xlu0 %606  ;;  %701 = vmatprep.mubr.f32.mxu0 %v1612_v0 }
 0x17a   : > { %v605_v30 = vpop.permute.xlu1 %604  ;;  %1548 = vmatprep.subr.msk.mxu1 %vm446_vm2, %v1133_v25  ;;  %1103 = vmatprep.mubr.f32.mxu1 %v1612_v0 }
 0x17b   : > { %v609_v32 = vsel %vm608_vm9, %v605_v30, %v607_v28  ;;  %v610_v33 = vsel %vm608_vm9, %v607_v28, %v605_v30 }
 0x17c   : > { %v624_v35 = vmul.f32 %v617_v26, %v610_v33  ;;  %v625_v36 = vmul.f32 %v621_v27, %v609_v32 }
 0x17d   : > { %v1221_v38 = vpop.permute.xlu0 %1220 }
 0x17e   : > { %v1219_v41 = vpop.permute.xlu1 %1218  ;;  %1524 = vmatprep.subr.msk.mxu0 %vm446_vm2, %v625_v36 }
 0x17f   : > { %v1224_v43 = vsel %vm1222_vm10, %v1221_v38, %v1219_v41  ;;  %1525 = vmatpush1.msk.msra.mxu0 %vm446_vm2, %v624_v35  ;;  %v1223_v45 = vsel %vm1222_vm10, %v1219_v41, %v1221_v38 }
 0x180   : > { %v1239_v44 = vmul.f32 %v1235_v37, %v1224_v43  ;;  %1526 = vmatmul.mubr.msk.f32.vlgmr.msra.gmra.mrb[2].mxu0 %vm442_vm4, %v1523_v39  ;;  %1545 = vmatmul.mubr.msk.f32.vlgmr.msra.gmra.mrb[0].mxu1 %vm442_vm4, %v1542_v40  ;;  %v1238_v47 = vmul.f32 %v1231_v24, %v1223_v45 }
 0x181   : > { %1549 = vmatpush1.msk.msra.mxu1 %vm446_vm2, %v1132_v42  ;;  %1209 = vmatprep.mubr.f32.mxu1 %v1612_v0 }
 0x182   : > { %1553 = vmatprep.subr.msk.mxu1 %vm446_vm2, %v1239_v44  ;;  %1424 = vmatprep.mubr.f32.mxu0 %v1612_v0 }
 0x188   : > { %1550 = vmatmul.mubr.msk.f32.vlgmr.msra.gmra.mrb[0].mxu1 %vm442_vm4, %v1547_v46 }
 0x189   : > { %1554 = vmatpush1.msk.msra.mxu1 %vm446_vm2, %v1238_v47  ;;  %1315 = vmatprep.mubr.f32.mxu1 %v1612_v0 }
 0x18e   : > { %v1341_v60 = vpop.permute.xlu0 %1340 }
 0x18f   : > { %v1328_v52 = vpop.permute.xlu1 %1327 }
 0x190   : > { %1555 = vmatmul.mubr.msk.f32.vlgmr.msra.gmra.mrb[0].mxu1 %vm442_vm4, %v1552_v48 }
 0x193   : > { %v1346_v6 = vpop.permute.xlu1 %1345 }
 0x253   : > { %v703_v23 = vpop.f32.mrb[2].mxu0 }
 0x254   : > { %v705_v22 = vpop.f32.mrb[3].mxu0 }
 0x263   : > { %v1317_v49 = vpop.f32.mrb[0].mxu1 }
 0x264   : > { %v1568_v50 = vadd.f32 %v1317_v49, %v703_v23  ;;  %v1319_v51 = vpop.f32.mrb[1].mxu1 }
 0x265   : > { %v1569_v53 = vadd.f32 %v1319_v51, %v705_v22 }
 0x266   : > { %v1330_v54 = vadd.f32 %v1568_v50, %v1328_v52 }
 0x267   : > { %v1331_v55 = vadd.f32 %v1569_v53, %v1328_v52 }
 0x268   : > { %v1332_v57 = vmax.f32 %v1330_v54, 0.0 }
 0x269   : > { %v1333_v56 = vmax.f32 %v1331_v55, 0.0 }
 0x26b   : > { %1556 = vmatprep.subr.msk.mxu0 %vm446_vm2, %v1333_v56 }
 0x26c   : > { %1557 = vmatpush1.msk.msra.mxu0 %vm446_vm2, %v1332_v57 }
 0x26d   : > { %1558 = vmatmul.mubr.msk.f32.vlgmr.msra.gmra.mrb[4].mxu0 %vm442_vm4, %v1334_v58 }
 0x26e   : > { %1430 = vmatprep.mubr.f32.mxu0 %v1612_v0 }
 0x271   : > { %1559 = vmatmul.mubr.msk.f32.gmra.mrb[6].mxu0 %vm442_vm4, %v1335_v59 }
 0x340   : > { %v1426_v61 = vpop.f32.mrb[4].mxu0 }
 0x341   : > { %v1427_v62 = vadd.f32 %v1426_v61, %v1341_v60  ;;  %v1428_v63 = vpop.f32.mrb[5].mxu0 }
 0x342   : > { %v1429_v1 = vadd.f32 %v1428_v63, %v1341_v60 }
 0x343   : > { %v1437_v2 = vadd.f32 %v1427_v62, %v1692_v5 }
 0x344   : > { %v1438_v0 = vadd.f32 %v1429_v1, %v1688_v3  ;;  %v1432_v8 = vpop.f32.mrb[6].mxu0 }
 0x345   : > { %v1441_v9 = vmax.f32 %v1437_v2, 0.0  ;;  %v1433_v10 = vadd.f32 %v1432_v8, %v1346_v6  ;;  %v1434_v11 = vpop.f32.mrb[7].mxu0 }
 0x346   : > { %v1442_v12 = vmax.f32 %v1438_v0, 0.0  ;;  %v1435_v13 = vadd.f32 %v1434_v11, %v1346_v6 }
 0x347   : > { %1445 = vst [vmem:[%s305_s12] sm:$0xff] %v1441_v9  ;;  %v1439_v14 = vadd.f32 %v1433_v10, %v1696_v7 }
 0x348   : > { %1446 = vst [vmem:[%s305_s12 + $0x8] sm:$0xff] %v1442_v12  ;;  %v1440_v5 = vadd.f32 %v1435_v13, %v1690_v4 }
 0x349   : > { %v1443_v15 = vmax.f32 %v1439_v14, 0.0 }
 0x34a   : > { %v1444_v16 = vmax.f32 %v1440_v5, 0.0 }
 0x34b   : > { %1447 = vst [vmem:[%s305_s12 + $0x10] sm:$0xff] %v1443_v15 }
 0x34c   : > { %1448 = vst [vmem:[%s305_s12 + $0x18] sm:$0xff] %v1444_v16 }
 0x34d PF: > { %s18_s27 = sadd.s32 1, %s1610_s27  }
 0x34e   : > { %p15_p4 = scmp.ge.s32.totalorder %s18_s27, 4  }
 0x350   :  { %17 = sbr.rel (!%p15_p4) target bundleno = 1 (0x1), region = 97 }

</bundles_post_ra>
